<compile_context>
chip_gen: v7x
topology: tpu7x:2x2x1
jax: 0.10.0
libtpu: 0.0.40
codegen_flags: <defaults>
</compile_context>

<pallas_src>
import math

import jax
import jax.numpy as jnp
from jax.experimental import pallas as pl
from jax.experimental.pallas import tpu as pltpu

EMBEDDING_PROJECTION = 256
GLOVE_DIM = 300
FAST_TEXT_DIM = 300
LEVY_DIM = 300
FUSED_DIM = GLOVE_DIM + FAST_TEXT_DIM + LEVY_DIM  # 900

DEFAULT_TM = 1024                       # row tile over M = B*S
_RESIDENT_VOCAB_MAX = 2048              # keep fused table resident below this
_VMEM_TILE_BUDGET = 36 * 1024 * 1024    # tile + resident footprint budget
_VMEM_LIMIT_BYTES = 48 * 1024 * 1024    # scoped-VMEM cap (v7x-safe)


def _cdiv(a, b):
    return (a + b - 1) // b


def _round_up(x, m):
    return ((x + m - 1) // m) * m


# ---------------------------------------------------------------------------
# Kernels
# ---------------------------------------------------------------------------
def _dme_resident_kernel(ids_ref, table_ref, w_ref, b_ref, o_ref):
    """In-kernel gather (one-hot MXU) + fused projection + bias + ReLU.

    ids_ref:   (TM, 1)  int32  — streamed tile of token ids
    table_ref: (V, 900) bf16   — VMEM-resident fused embedding table
    w_ref:     (900, 256) bf16 — VMEM-resident fused projection
    b_ref:     (1, 256) f32    — pre-summed bias
    """
    ids = ids_ref[...]                                         # (TM, 1)
    tm = ids.shape[0]
    vocab = table_ref.shape[0]
    cols = jax.lax.broadcasted_iota(jnp.int32, (tm, vocab), 1)
    one_hot = jnp.where(cols == ids, 1.0, 0.0).astype(jnp.bfloat16)  # (TM, V)
    # Exact row selection on the MXU (one-hot x bf16 rows, f32 accumulate).
    emb = jnp.dot(one_hot, table_ref[...],
                  preferred_element_type=jnp.float32).astype(jnp.bfloat16)
    y = jnp.dot(emb, w_ref[...], preferred_element_type=jnp.float32)
    y = y + b_ref[...]
    o_ref[...] = jnp.maximum(y, 0.0).astype(o_ref.dtype)
    # TODO(synk): torch.nn.Dropout(p=0.2) in train mode is stochastic; treated
    # as identity (eval mode).  For train parity build the mask with
    # pltpu.prng_seed + pltpu.prng_random_bits here.


def _dme_stream_kernel(x_ref, w_ref, b_ref, o_ref):
    """Fallback: pre-gathered bf16 activation tile -> projection + bias + ReLU."""
    y = jnp.dot(x_ref[...], w_ref[...], preferred_element_type=jnp.float32)
    y = y + b_ref[...]
    o_ref[...] = jnp.maximum(y, 0.0).astype(o_ref.dtype)


# ---------------------------------------------------------------------------
# Parameter preparation (hoisted, done once per model)
# ---------------------------------------------------------------------------
def prepare_fused_params(params, *, param_dtype=jnp.bfloat16):
    """Fuse tables / weights / biases.

    Returns:
      fused_table: (vocab, 900) column-concatenated embedding table (bf16).
      fused_w:     (900, 256)   pre-transposed, row-concatenated projection (bf16).
      fused_b:     (1, 256)     pre-summed bias (f32).
    """
    fused_table = jnp.concatenate(
        [params["glove_emb"], params["fast_text_emb"], params["levy_emb"]],
        axis=1).astype(param_dtype)
    # PyTorch Linear: y = x @ W.T + b  -> pre-transpose to (in, out), stack on K.
    fused_w = jnp.concatenate(
        [params["P_glove_w"].T, params["P_fast_text_w"].T, params["P_levy_w"].T],
        axis=0).astype(param_dtype)
    fused_b = (params["P_glove_b"] + params["P_fast_text_b"]
               + params["P_levy_b"]).astype(jnp.float32).reshape(
                   1, EMBEDDING_PROJECTION)
    return fused_table, fused_w, fused_b


# ---------------------------------------------------------------------------
# Forward
# ---------------------------------------------------------------------------
def unweighted_dme_forward(ids, fused_table, fused_w, fused_b, *,
                           tm=DEFAULT_TM, out_dtype=jnp.float32,
                           resident=None):
    """ids: int32 (B, S). Returns (B, S, EMBEDDING_PROJECTION) in out_dtype.

    out_dtype=jnp.bfloat16 halves output writeback if downstream tolerates it.
    resident=None -> auto-select in-kernel gather path for small vocabularies.
    """
    B, S = ids.shape
    M = B * S
    vocab, fused_dim = fused_table.shape
    assert fused_w.shape == (fused_dim, EMBEDDING_PROJECTION)
    if resident is None:
        resident = vocab <= _RESIDENT_VOCAB_MAX

    out_bytes = jnp.dtype(out_dtype).itemsize
    tbl_bytes = jnp.dtype(fused_table.dtype).itemsize
    w_bytes = jnp.dtype(fused_w.dtype).itemsize

    # --- per-row / resident VMEM footprint estimates -> pick TM -------------
    if resident:
        per_row = (2 * (4 + EMBEDDING_PROJECTION * out_bytes)      # ids + out (dbl-buf)
                   + vocab * 2 + fused_dim * 2                      # one-hot + emb temps
                   + EMBEDDING_PROJECTION * 4)                      # f32 pre-ReLU temp
        resident_bytes = (vocab * fused_dim * tbl_bytes
                          + fused_dim * EMBEDDING_PROJECTION * w_bytes
                          + EMBEDDING_PROJECTION * 4)
    else:
        per_row = (2 * (fused_dim * tbl_bytes
                        + EMBEDDING_PROJECTION * out_bytes)         # act + out (dbl-buf)
                   + EMBEDDING_PROJECTION * 4)
        resident_bytes = (fused_dim * EMBEDDING_PROJECTION * w_bytes
                          + EMBEDDING_PROJECTION * 4)

    TM = min(tm, _round_up(M, 8))
    while TM > 128 and resident_bytes + TM * per_row > _VMEM_TILE_BUDGET:
        TM = max(128, _round_up(TM // 2, 8))
    # v7x has 2 TensorCores: make sure the "parallel" M axis has >= 2 steps.
    if _cdiv(M, TM) < 2 and M >= 16:
        TM = _round_up(_cdiv(M, 2), 8)
    Mp = _round_up(M, TM)

    vmem_limit = int(min(max(2 * (resident_bytes + TM * per_row) + (1 << 20),
                             32 << 20),
                         _VMEM_LIMIT_BYTES))

    flat_ids = ids.reshape(M).astype(jnp.int32)
    if Mp != M:
        flat_ids = jnp.pad(flat_ids, (0, Mp - M))
    grid = (Mp // TM,)

    compiler_params = pltpu.CompilerParams(
        dimension_semantics=("parallel",),
        vmem_limit_bytes=vmem_limit)

    if resident:
        # Resident-table path: ids in, output out — no HBM activation traffic.
        ids2d = flat_ids.reshape(Mp, 1)
        out_flat = pl.pallas_call(
            _dme_resident_kernel,
            out_shape=jax.ShapeDtypeStruct((Mp, EMBEDDING_PROJECTION), out_dtype),
            grid=grid,
            in_specs=[
                pl.BlockSpec((TM, 1), lambda i: (i, 0)),                 # ids tile
                pl.BlockSpec((vocab, fused_dim), lambda i: (0, 0)),      # table (resident)
                pl.BlockSpec((fused_dim, EMBEDDING_PROJECTION),
                             lambda i: (0, 0)),                          # weight (resident)
                pl.BlockSpec((1, EMBEDDING_PROJECTION), lambda i: (0, 0)),  # bias
            ],
            out_specs=pl.BlockSpec((TM, EMBEDDING_PROJECTION), lambda i: (i, 0)),
            compiler_params=compiler_params,
        )(ids2d, fused_table, fused_w, fused_b)
    else:
        # Large-vocab fallback: bf16 XLA gather, then streamed matmul kernel.
        # TODO(synk): fuse this gather into the kernel with scalar-prefetched
        # ids + per-row pltpu.make_async_copy DMAs from the HBM table.
        emb = jnp.take(fused_table, flat_ids, axis=0)                    # (Mp, 900) bf16
        out_flat = pl.pallas_call(
            _dme_stream_kernel,
            out_shape=jax.ShapeDtypeStruct((Mp, EMBEDDING_PROJECTION), out_dtype),
            grid=grid,
            in_specs=[
                pl.BlockSpec((TM, fused_dim), lambda i: (i, 0)),         # act tile
                pl.BlockSpec((fused_dim, EMBEDDING_PROJECTION),
                             lambda i: (0, 0)),                          # weight (resident)
                pl.BlockSpec((1, EMBEDDING_PROJECTION), lambda i: (0, 0)),  # bias
            ],
            out_specs=pl.BlockSpec((TM, EMBEDDING_PROJECTION), lambda i: (i, 0)),
            compiler_params=compiler_params,
        )(emb, fused_w, fused_b)

    return out_flat[:M].reshape(B, S, EMBEDDING_PROJECTION)


# ---------------------------------------------------------------------------
# Init (distribution-faithful to the PyTorch module) + demo / check
# ---------------------------------------------------------------------------
def init_params(key, vocab_size):
    keys = jax.random.split(key, 9)

    emb_bound = math.sqrt(3.0 / GLOVE_DIM)
    glove_emb = jax.random.uniform(
        keys[0], (vocab_size, GLOVE_DIM), jnp.float32, -emb_bound, emb_bound)
    fast_text_emb = jax.random.uniform(
        keys[1], (vocab_size, FAST_TEXT_DIM), jnp.float32, -emb_bound, emb_bound)
    levy_emb = jax.random.uniform(
        keys[2], (vocab_size, LEVY_DIM), jnp.float32, -emb_bound, emb_bound)

    def xavier(k, out_dim, in_dim):
        bound = math.sqrt(6.0 / (in_dim + out_dim))
        return jax.random.uniform(k, (out_dim, in_dim), jnp.float32, -bound, bound)

    def bias(k, out_dim, in_dim):
        bound = 1.0 / math.sqrt(in_dim)
        return jax.random.uniform(k, (out_dim,), jnp.float32, -bound, bound)

    return {
        "glove_emb": glove_emb,
        "fast_text_emb": fast_text_emb,
        "levy_emb": levy_emb,
        "P_glove_w": xavier(keys[3], EMBEDDING_PROJECTION, GLOVE_DIM),
        "P_glove_b": bias(keys[4], EMBEDDING_PROJECTION, GLOVE_DIM),
        "P_fast_text_w": xavier(keys[5], EMBEDDING_PROJECTION, FAST_TEXT_DIM),
        "P_fast_text_b": bias(keys[6], EMBEDDING_PROJECTION, FAST_TEXT_DIM),
        "P_levy_w": xavier(keys[7], EMBEDDING_PROJECTION, LEVY_DIM),
        "P_levy_b": bias(keys[8], EMBEDDING_PROJECTION, LEVY_DIM),
    }


def _reference_forward(ids, p):
    """Pure-JAX f32 reference, un-fused, mirroring the PyTorch module."""
    M = ids.size
    flat = ids.reshape(M)
    eg = jnp.take(p["glove_emb"], flat, axis=0)
    ef = jnp.take(p["fast_text_emb"], flat, axis=0)
    el = jnp.take(p["levy_emb"], flat, axis=0)
    og = eg @ p["P_glove_w"].T + p["P_glove_b"]
    of = ef @ p["P_fast_text_w"].T + p["P_fast_text_b"]
    ol = el @ p["P_levy_w"].T + p["P_levy_b"]
    return jax.nn.relu(og + of + ol).reshape(
        ids.shape[0], ids.shape[1], EMBEDDING_PROJECTION)


if __name__ == "__main__":
    key = jax.random.PRNGKey(0)
    k_params, k_ids = jax.random.split(key)

    VOCAB = 64
    B, S = 2, 8
    params = init_params(k_params, VOCAB)
    ids = jax.random.randint(k_ids, (B, S), 0, VOCAB, dtype=jnp.int32)

    # Hoisted once per model (not per forward call).
    fused_table, fused_w, fused_b = prepare_fused_params(params)

    ref_out = _reference_forward(ids, params)

    # Path 1: resident-table, in-kernel gather (small vocab fast path).
    out_resident = unweighted_dme_forward(ids, fused_table, fused_w, fused_b)
    out_resident = jax.block_until_ready(out_resident)

    # Path 2: streaming fallback (large-vocab code path, exercised here too).
    out_stream = unweighted_dme_forward(ids, fused_table, fused_w, fused_b,
                                        resident=False)
    out_stream = jax.block_until_ready(out_stream)

    assert out_resident.shape == (B, S, EMBEDDING_PROJECTION)
    assert out_stream.shape == (B, S, EMBEDDING_PROJECTION)
    # bf16 params -> loosened tolerance vs the f32 reference (per perf review).
    assert jnp.allclose(out_resident, ref_out, atol=1e-2, rtol=5e-2)
    assert jnp.allclose(out_stream, ref_out, atol=1e-2, rtol=5e-2)
    print("KERNEL_OK")
</pallas_src>

<mosaic_0001>
module attributes {stable_mosaic.version = 11 : i64} {
  func.func @_dme_resident_kernel(%arg0: i32, %arg1: memref<8x1xi32, #tpu.memory_space<vmem>>, %arg2: memref<64x900xbf16, #tpu.memory_space<vmem>>, %arg3: memref<900x256xbf16, #tpu.memory_space<vmem>>, %arg4: memref<1x256xf32, #tpu.memory_space<vmem>>, %arg5: memref<8x256xf32, #tpu.memory_space<vmem>>) attributes {dimension_semantics = [#tpu.dimension_semantics<parallel>], iteration_bounds = array<i64: 2>, scalar_prefetch = 0 : i64, scratch_operands = 0 : i64, tpu.core_type = #tpu.core_type<tc>, window_params = [{transform_indices = @transform_0, window_bounds = array<i64: 8, 1>}, {pipeline_mode = #tpu.pipeline_mode<synchronous>, transform_indices = @transform_1, window_bounds = array<i64: 64, 900>}, {pipeline_mode = #tpu.pipeline_mode<synchronous>, transform_indices = @transform_2, window_bounds = array<i64: 900, 256>}, {pipeline_mode = #tpu.pipeline_mode<synchronous>, transform_indices = @transform_3, window_bounds = array<i64: 1, 256>}, {transform_indices = @transform_4, window_bounds = array<i64: 8, 256>}]} {
    %c0 = arith.constant 0 : index
    %c0_0 = arith.constant 0 : index
    %0 = vector.load %arg1[%c0, %c0_0] : memref<8x1xi32, #tpu.memory_space<vmem>>, vector<8x1xi32>
    %1 = tpu.iota {dimensions = array<i32: 1>} : vector<8x64xi32>
    %2 = vector.broadcast %0 : vector<8x1xi32> to vector<8x64xi32>
    %3 = arith.cmpi eq, %1, %2 : vector<8x64xi32>
    %cst = arith.constant 1.000000e+00 : f32
    %cst_1 = arith.constant 0.000000e+00 : f32
    %4 = vector.broadcast %cst : f32 to vector<8x64xf32>
    %5 = vector.broadcast %cst_1 : f32 to vector<8x64xf32>
    %6 = arith.select %3, %4, %5 : vector<8x64xi1>, vector<8x64xf32>
    %7 = arith.truncf %6 : vector<8x64xf32> to vector<8x64xbf16>
    %c0_2 = arith.constant 0 : index
    %c0_3 = arith.constant 0 : index
    %8 = vector.load %arg2[%c0_2, %c0_3] : memref<64x900xbf16, #tpu.memory_space<vmem>>, vector<64x900xbf16>
    %cst_4 = arith.constant dense<0.000000e+00> : vector<8x900xf32>
    %9 = tpu.matmul %7, %8, %cst_4 {dimension_numbers = #tpu.dot_dimension_numbers<[1], [0], [0], [1], [0, 0, 1, 1], [], []>} : vector<8x64xbf16>, vector<64x900xbf16>, vector<8x900xf32> -> vector<8x900xf32>
    %10 = arith.truncf %9 : vector<8x900xf32> to vector<8x900xbf16>
    %c0_5 = arith.constant 0 : index
    %c0_6 = arith.constant 0 : index
    %11 = vector.load %arg3[%c0_5, %c0_6] : memref<900x256xbf16, #tpu.memory_space<vmem>>, vector<900x256xbf16>
    %cst_7 = arith.constant dense<0.000000e+00> : vector<8x256xf32>
    %12 = tpu.matmul %10, %11, %cst_7 {dimension_numbers = #tpu.dot_dimension_numbers<[1], [0], [0], [1], [0, 0, 1, 1], [], []>} : vector<8x900xbf16>, vector<900x256xbf16>, vector<8x256xf32> -> vector<8x256xf32>
    %c0_8 = arith.constant 0 : index
    %c0_9 = arith.constant 0 : index
    %13 = vector.load %arg4[%c0_8, %c0_9] : memref<1x256xf32, #tpu.memory_space<vmem>>, vector<1x256xf32>
    %14 = vector.broadcast %13 : vector<1x256xf32> to vector<8x256xf32>
    %15 = arith.addf %12, %14 : vector<8x256xf32>
    %cst_10 = arith.constant 0.000000e+00 : f32
    %16 = vector.broadcast %cst_10 : f32 to vector<8x256xf32>
    %17 = arith.maximumf %15, %16 : vector<8x256xf32>
    %c0_11 = arith.constant 0 : index
    %c0_12 = arith.constant 0 : index
    %18 = vector.load %arg5[%c0_11, %c0_12] : memref<8x256xf32, #tpu.memory_space<vmem>>, vector<8x256xf32>
    tpu.vector_store %arg5[%c0_11, %c0_12], %17 {strides = array<i32>} : memref<8x256xf32, #tpu.memory_space<vmem>>, vector<8x256xf32>,
    return
  }
  func.func @transform_0(%arg0: i32) -> (i32, i32) {
    %c0_i32 = arith.constant 0 : i32
    %c0_i32_0 = arith.constant 0 : i32
    return %arg0, %c0_i32 : i32, i32
  }
  func.func @transform_1(%arg0: i32) -> (i32, i32) {
    %c0_i32 = arith.constant 0 : i32
    %c0_i32_0 = arith.constant 0 : i32
    %c0_i32_1 = arith.constant 0 : i32
    return %c0_i32, %c0_i32_0 : i32, i32
  }
  func.func @transform_2(%arg0: i32) -> (i32, i32) {
    %c0_i32 = arith.constant 0 : i32
    %c0_i32_0 = arith.constant 0 : i32
    %c0_i32_1 = arith.constant 0 : i32
    return %c0_i32, %c0_i32_0 : i32, i32
  }
  func.func @transform_3(%arg0: i32) -> (i32, i32) {
    %c0_i32 = arith.constant 0 : i32
    %c0_i32_0 = arith.constant 0 : i32
    %c0_i32_1 = arith.constant 0 : i32
    return %c0_i32, %c0_i32_0 : i32, i32
  }
  func.func @transform_4(%arg0: i32) -> (i32, i32) {
    %c0_i32 = arith.constant 0 : i32
    %c0_i32_0 = arith.constant 0 : i32
    return %arg0, %c0_i32 : i32, i32
  }
}

</mosaic_0001>

<bundles_post_ra>
// kernel: tpu_custom_call.1
= control target key start
LH: loop header
LB: loop body
LE: loop exit
PB: predicated region body
PF: predicated region fallthrough
CT: control target
= control target key end

     0   :  { %9 = vsyncpa [#allocation3], 0  ;;  %s2349_s0 = inlined_call_operand.vmem [shape: s32[16,1], index: 0, kind: input, shape index: {}]   ;;  %s2350_s1 = inlined_call_operand.hbm [shape: bf16[64,900], index: 1, kind: input, shape index: {}]   ;;  %s2351_s2 = inlined_call_operand.hbm [shape: bf16[900,256], index: 2, kind: input, shape index: {}]   ;;  %s2352_s3 = inlined_call_operand.vmem [shape: f32[1,256], index: 3, kind: input, shape index: {}]   ;;  %s2353_s4 = inlined_call_operand.hbm [shape: f32[16,256], index: 4, kind: output, shape index: {}]  }
   0x1   :  { %10 = vsyncpa [#allocation6], 0 }
   0x2   :  { %11 = vsyncpa [#allocation4], 0 }
   0x3   :  { %13 = vsyncpa [#allocation4 + $0x1], 0  ;;  %s2145_s15 = smov 0   ;;  %s2147_s16 = smov 0  }
   0x4   :  { %s2149_s17 = smov 0   ;;  %s2151_s18 = smov 0  }
   0x5 LB: > { %s2166_s19 = sadd.s32 4294967295, %s2109_s18   ;;  %s1566_s20 = sadd.s32 4294967294, %s2109_s18   ;;  %s2109_s18 = sphi %s2151_s18, %s2371_s18   ;;  %s2105_s17 = sphi %s2149_s17, %s2370_s17   ;;  %s2101_s16 = sphi %s2147_s16, %s2369_s16   ;;  %s2097_s15 = sphi %s2145_s15, %s2368_s15  }
   0x6   : > { %s2170_s21 = sadd.s32 1, %s2109_s18   ;;  %s115_s22 = sadd.s32 1, %s2105_s17 }
   0x7   : > { %s112_s23 = ssub.s32 %s2109_s18, %s2170_s21  ;;  %p125_p0 = scmp.ne.s32.totalorder %s2105_s17, %s2101_s16 }
   0x8   : > { %p113_p1 = scmp.eq.s32.totalorder %s112_s23, 0  ;;  %p126_p2 = scmp.eq.s32.totalorder %s2166_s19, 1 }
   0x9   : > { %p131_p3 = scmp.ne.s32.totalorder %s2101_s16, %s2097_s15  ;;  %p132_p4 = scmp.eq.s32.totalorder %s1566_s20, 1 }
   0xa   : > { %s2181_s24 = scalar_select %p113_p1, %s2105_s17, %s115_s22  }
   0xb   : > { %p2183_p5 = por %p126_p2, %p125_p0  ;;  %p2187_p6 = por %p132_p4, %p131_p3 }
   0xc   : > { %p1567_p7 = scmp.ge.s32.totalorder %s2109_s18, 1  ;;  %p139_p8 = scmp.lt.s32.totalorder %s2109_s18, 3 }
   0xd   : > { %s2357_s25 = scalar_select %p2183_p5, 1, 0 }
   0xe   : > { %s2358_s26 = scalar_select %p2187_p6, 1, 0 }
   0xf   : > { %p2354_p9 = scmp.eq.s32.totalorder %s2166_s19, 0  ;;  %p2194_p10 = pnand %p1567_p7, %p139_p8 }
  0x10   : > { %s2111_s28 = smov [#allocation2]   ;;  %s2112_s5 = smov [#allocation5]  }
  0x11   : > { %s2359_s27 = scalar_select %p2194_p10, 1, 0 }
  0x12   : > { %s151_s29 = sshll.u32 %s2111_s28, 4  ;;  %p1756_p11 = pneg %p2194_p10  ;;  %s152_s29 = int_to_ptr.vmem [resolvable:$true] %s151_s29 }
  0x13   : > { %s164_s6 = sshll.u32 %s2112_s5, 4  ;;  %s1983_s9 = scalar_lea.hbm %s2350_s1, 4096  ;;  %s2206_s6 = int_to_ptr.vmem [resolvable:$true] %s164_s6 }
  0x14   : > { %p2202_p12 = pnand %p2354_p9, %p1756_p11  ;;  %p1984_p13 = scmp.ne.s32.totalorder %s2350_s1, %s1983_s9 }
  0x15   : > { %p1990_p3 = scmp.lt.u32.totalorder %s1983_s9, %s2350_s1 }
  0x16   : > { %p1985_p0 = pneg %p2202_p12 }
  0x18   : > { %p1986_p1 = pnand %p1985_p0, %p1984_p13 }
  0x1a   : > { %p1987_p2 = pneg %p1986_p1 }
  0x1c   : > { %p1992_p4 = pnand %p1990_p3, %p1987_p2 }
  0x1e   : > { %1995 = shalt.err (!%p1992_p4)
}
  0x1f   : > { %s1996_s14 = scalar_lea.vmem %s152_s29, 4096  ;;  %p2004_p9 = scmp.lt.s32.totalorder %s152_s29, %s152_s29 }
  0x20   : > { %p1997_p7 = scmp.ne.s32.totalorder %s152_s29, %s1996_s14  ;;  %p2005_p6 = scmp.lt.s32.totalorder %s1996_s14, %s1996_s14 }
  0x22   : > { %p1999_p8 = pnand %p1997_p7, %p1985_p0  ;;  %p2006_p5 = por %p2005_p6, %p2004_p9 }
  0x24   : > { %p2000_p11 = pneg %p1999_p8 }
  0x26   : > { %p2007_p10 = pnand %p2006_p5, %p2000_p11 }
  0x28   : > { %2010 = shalt.err (!%p2007_p10)
}
  0x29   : > { %s2113_s20 = smov 512   ;;  %s2114_s22 = smov 32  }
  0x2a   : > { %1759 = dma.hbm_to_vmem [thread:$0]  (!%p2202_p12), %s2350_s1, 4096, %s152_s29, [#allocation3], %s2113_s20, %s2113_s20, %s2114_s22  }
  0x2b   : > { %s2011_s8 = scalar_lea.hbm %s2351_s2, 14464 }
  0x2c   : > { %p2012_p13 = scmp.ne.s32.totalorder %s2351_s2, %s2011_s8  ;;  %p2018_p9 = scmp.lt.u32.totalorder %s2011_s8, %s2351_s2 }
  0x2e   : > { %p2014_p5 = pnand %p2012_p13, %p1985_p0 }
  0x30   : > { %p2015_p6 = pneg %p2014_p5 }
  0x32   : > { %p2020_p10 = pnand %p2018_p9, %p2015_p6 }
  0x34   : > { %2023 = shalt.err (!%p2020_p10)
}
  0x35   : > { %s2024_s29 = scalar_lea.vmem %s2206_s6, 14464  ;;  %p2032_p4 = scmp.lt.s32.totalorder %s2206_s6, %s2206_s6 }
  0x36   : > { %p2025_p1 = scmp.ne.s32.totalorder %s2206_s6, %s2024_s29  ;;  %p2033_p7 = scmp.lt.s32.totalorder %s2024_s29, %s2024_s29 }
  0x38   : > { %p2027_p2 = pnand %p2025_p1, %p1985_p0  ;;  %p2034_p8 = por %p2033_p7, %p2032_p4 }
  0x3a   : > { %p2028_p3 = pneg %p2027_p2 }
  0x3c   : > { %p2035_p11 = pnand %p2034_p8, %p2028_p3 }
  0x3e   : > { %2038 = shalt.err (!%p2035_p11)
}
  0x3f   : > { %s2115_s13 = smov 128   ;;  %s2116_s14 = smov 8  }
  0x40   : > { %1762 = dma.hbm_to_vmem [thread:$0]  (!%p2202_p12), %s2351_s2, 14464, %s2206_s6, [#allocation6], %s2115_s13, %s2115_s13, %s2116_s14  }
  0x41   : > { %p2361_p13 = scmp.ne.s32.totalorder %s2359_s27, 0 }
  0x42   : > { %p2362_p0 = scmp.eq.s32.totalorder (!%p2361_p13), %s2166_s19, 0 }
  0x43   : > { %190 = sbr.rel (%p2361_p13) target bundleno = 732 (0x2dc), region = 36 }
  0x4a   : > { %2084 = dma.done.wait (%p2362_p0), [#allocation3], 4096   ;;  %p2363_p5 = pmov %p2362_p0 }
  0x4b   : > { %p2364_p6 = pmov %p2362_p0 }
  0x4c   : > { %2086 = vsyncadd (%p2363_p5), [#allocation3], 4294963200 }
  0x4d   : > { %2088 = dma.done.wait (%p2364_p6), [#allocation6], 14464   ;;  %p2365_p9 = pmov %p2362_p0 }
  0x4e   : > { %p219_p10 = scmp.lt.s32.totalorder %s2166_s19, 1  ;;  %v2117_v0 = vmov 0   ;;  %v233_v2 = vld [vmem:[#allocation2] sm:$0xff]  ;;  %v236_v6 = vld [vmem:[#allocation2 + $0x18] sm:$0xff]  ;;  %v234_v25 = vld [vmem:[#allocation2 + $0x8] sm:$0xff]  ;;  %v225_v39 = vlaneseq  ;;  %v2118_v44 = vmov 0.0  }
  0x4f   : > { %2090 = vsyncadd (%p2365_p9), [#allocation6], 4294952832  ;;  %1812 = vset.pattern.permute.xlu0 %v2117_v0  ;;  %461 = vmatprep.mubr.bf16.mxu0 %v2117_v0  ;;  %v237_v3 = vld [vmem:[#allocation2 + $0x20] sm:$0xff]  ;;  %v240_v7 = vld [vmem:[#allocation2 + $0x38] sm:$0xff]  ;;  %vm425_vm1 = vcmask 523264   ;;  %vm1291_vm2 = vcmask 31744  }
  0x50   : > { %s220_s27 = scalar_select %p219_p10, %s2166_s19, 1  ;;  %584 = vmatprep.mubr.bf16.mxu1 %v2117_v0  ;;  %v1577_v4 = vcombine.high %v233_v2, %v237_v3  ;;  %v1576_v5 = vcombine.low %v233_v2, %v237_v3  ;;  %v241_v8 = vld [vmem:[#allocation2 + $0x40] sm:$0xff]  ;;  %v1583_v9 = vcombine.high %v236_v6, %v240_v7  ;;  %v1582_v10 = vcombine.low %v236_v6, %v240_v7  ;;  %v244_v12 = vld [vmem:[#allocation2 + $0x58] sm:$0xff]  ;;  %v238_v29 = vld [vmem:[#allocation2 + $0x28] sm:$0xff] }
  0x51   : > { %v245_v11 = vld [vmem:[#allocation2 + $0x60] sm:$0xff]  ;;  %v248_v13 = vld [vmem:[#allocation2 + $0x78] sm:$0xff]  ;;  %v1578_v30 = vcombine.low %v234_v25, %v238_v29  ;;  %v1579_v37 = vcombine.high %v234_v25, %v238_v29  ;;  %v226_v40 = vand.u32 127, %v225_v39  ;;  %v242_v42 = vld [vmem:[#allocation2 + $0x48] sm:$0xff]  ;;  %vm1295_vm3 = vcmask 1041408   ;;  %s216_s8 = sand.u32 1, %s2101_s16  }
  0x52   : > { %s1575_s30 = sshll.u32 %s220_s27, 3  ;;  %429 = vmatprep.subr.bf16.mxu0 %v1577_v4  ;;  %v1585_v14 = vcombine.high %v241_v8, %v245_v11  ;;  %v1591_v15 = vcombine.high %v244_v12, %v248_v13  ;;  %v249_v16 = vld [vmem:[#allocation2 + $0x80] sm:$0xff]  ;;  %v252_v18 = vld [vmem:[#allocation2 + $0x98] sm:$0xff]  ;;  %552 = vmatprep.subr.bf16.mxu1 %v1583_v9  ;;  %v1584_v19 = vcombine.low %v241_v8, %v245_v11  ;;  %v246_v43 = vld [vmem:[#allocation2 + $0x68] sm:$0xff]  ;;  %s1574_s9 = sshll.u32 %s216_s8, 4 }
  0x53   : > { %s222_s28 = scalar_lea.vmem %s2349_s0, %s1575_s30  ;;  %v253_v17 = vld [vmem:[#allocation2 + $0xa0] sm:$0xff]  ;;  %430 = vmatpush1.bf16.msra.mxu0 %v1576_v5  ;;  %v256_v20 = vld [vmem:[#allocation2 + $0xb8] sm:$0xff]  ;;  %553 = vmatpush1.bf16.msra.mxu1 %v1582_v10  ;;  %v1590_v21 = vcombine.low %v244_v12, %v248_v13  ;;  %v1587_v47 = vcombine.high %v242_v42, %v246_v43  ;;  %v250_v49 = vld [vmem:[#allocation2 + $0x88] sm:$0xff]  ;;  %v1586_v52 = vcombine.low %v242_v42, %v246_v43  ;;  %s1733_s10 = sshll.u32 %s2166_s19, 8 }
  0x54   : > { %v224_v1 = vld [vmem:[%s222_s28] sm:$0xff]  ;;  %431 = vmatprep.subr.bf16.mxu0 %v1585_v14  ;;  %v1593_v22 = vcombine.high %v249_v16, %v253_v17  ;;  %v257_v23 = vld [vmem:[#allocation2 + $0xc0] sm:$0xff]  ;;  %554 = vmatprep.subr.bf16.mxu1 %v1591_v15  ;;  %v1599_v26 = vcombine.high %v252_v18, %v256_v20  ;;  %v260_v27 = vld [vmem:[#allocation2 + $0xd8] sm:$0xff]  ;;  %v1592_v31 = vcombine.low %v249_v16, %v253_v17  ;;  %s218_s11 = scalar_lea.vmem [#allocation7], %s1574_s9  ;;  %s2307_s14 = scalar_lea.hbm %s2353_s4, %s1733_s10 }
  0x55   : > { %228 = vperm.xlu0 %1812, %v224_v1   ;;  %v261_v24 = vld [vmem:[#allocation2 + $0xe0] sm:$0xff]  ;;  %v264_v28 = vld [vmem:[#allocation2 + $0xf8] sm:$0xff]  ;;  %v1598_v32 = vcombine.low %v252_v18, %v256_v20  ;;  %v254_v50 = vld [vmem:[#allocation2 + $0xa8] sm:$0xff]  ;;  %s1485_s12 = sshll.u32 %s218_s11, 4  ;;  %s1471_s19 = scalar_lea.sflag [#allocation4], %s216_s8  ;;  %s2309_s12 = int_to_ptr.vmem [resolvable:$true] %s1485_s12 }
  0x56   : > { %v1601_v33 = vcombine.high %v257_v23, %v261_v24  ;;  %v1607_v34 = vcombine.high %v260_v27, %v264_v28  ;;  %v1600_v35 = vcombine.low %v257_v23, %v261_v24  ;;  %v1606_v36 = vcombine.low %v260_v27, %v264_v28  ;;  %v1815_v38 = vld [vmem:[#allocation5 + $0x4] ss:$8 sps:$4 sm:$0xff]   ;;  %v1813_v48 = vld [vmem:[#allocation5] ss:$8 sps:$4 sm:$0xff]   ;;  %v1818_v51 = vld [vmem:[#allocation5 + $0x14] ss:$8 sps:$4 sm:$0xff]  }
  0x57   : > { %432 = vmatpush1.bf16.msra.mxu0 %v1584_v19  ;;  %555 = vmatpush1.bf16.msra.mxu1 %v1590_v21  ;;  %v1595_v53 = vcombine.high %v250_v49, %v254_v50  ;;  %v1816_v54 = vld [vmem:[#allocation5 + $0x10] ss:$8 sps:$4 sm:$0xff]   ;;  %v258_v55 = vld [vmem:[#allocation2 + $0xc8] sm:$0xff]  ;;  %v1594_v58 = vcombine.low %v250_v49, %v254_v50  ;;  %v1824_v63 = vld [vmem:[#allocation5 + $0x34] ss:$8 sps:$4 sm:$0xff]   ;;  %s2039_s20 = scalar_lea.vmem %s2309_s12, 256 }
  0x58   : > { %433 = vmatprep.subr.bf16.mxu0 %v1593_v22  ;;  %556 = vmatprep.subr.bf16.mxu1 %v1599_v26  ;;  %v262_v56 = vld [vmem:[#allocation2 + $0xe8] sm:$0xff]  ;;  %v235_v61 = vld [vmem:[#allocation2 + $0x10] sm:$0xff]  ;;  %p2040_p12 = scmp.ne.s32.totalorder %s2309_s12, %s2039_s20  ;;  %p2366_p1 = scmp.ne.s32.totalorder %s2357_s25, 0 }
  0x59   : > { %v1821_v57 = vld [vmem:[#allocation5 + $0x24] ss:$8 sps:$4 sm:$0xff]   ;;  %v1603_v59 = vcombine.high %v258_v55, %v262_v56  ;;  %v1819_v60 = vld [vmem:[#allocation5 + $0x20] ss:$8 sps:$4 sm:$0xff]   ;;  %v239_v62 = vld [vmem:[#allocation2 + $0x30] sm:$0xff]  ;;  %v1602_v1 = vcombine.low %v258_v55, %v262_v56  ;;  %s2119_s22 = smov [#allocation7]  }
  0x5a   : > { %v1581_v2 = vcombine.high %v235_v61, %v239_v62  ;;  %v1822_v3 = vld [vmem:[#allocation5 + $0x30] ss:$8 sps:$4 sm:$0xff]   ;;  %v1827_v6 = vld [vmem:[#allocation5 + $0x44] ss:$8 sps:$4 sm:$0xff]   ;;  %v1580_v7 = vcombine.low %v235_v61, %v239_v62  ;;  %v1825_v9 = vld [vmem:[#allocation5 + $0x40] ss:$8 sps:$4 sm:$0xff]   ;;  %p2041_p2 = pnand %p2040_p12, %p2366_p1 }
  0x5b   : > { %434 = vmatpush1.bf16.msra.mxu0 %v1592_v31  ;;  %557 = vmatpush1.bf16.msra.mxu1 %v1598_v32  ;;  %v243_v4 = vld [vmem:[#allocation2 + $0x50] sm:$0xff]  ;;  %v1833_v18 = vld [vmem:[#allocation5 + $0x64] ss:$8 sps:$4 sm:$0xff]   ;;  %v1831_v21 = vld [vmem:[#allocation5 + $0x60] ss:$8 sps:$4 sm:$0xff]   ;;  %s2043_s27 = sshll.u32 %s2119_s22, 4  ;;  %s2044_s27 = int_to_ptr.vmem [resolvable:$false] %s2043_s27 }
  0x5c   : > { %435 = vmatprep.subr.bf16.mxu0 %v1601_v33  ;;  %558 = vmatprep.subr.bf16.mxu1 %v1607_v34  ;;  %v247_v5 = vld [vmem:[#allocation2 + $0x70] sm:$0xff]  ;;  %v1839_v24 = vld [vmem:[#allocation5 + $0x204] ss:$8 sps:$4 sm:$0xff]   ;;  %v1837_v26 = vld [vmem:[#allocation5 + $0x200] ss:$8 sps:$4 sm:$0xff]   ;;  %p2042_p3 = pneg %p2041_p2  ;;  %s2045_s30 = scalar_lea.vmem %s2044_s27, 512 }
  0x5d   : > { %v1589_v8 = vcombine.high %v243_v4, %v247_v5  ;;  %v251_v10 = vld [vmem:[#allocation2 + $0x90] sm:$0xff]  ;;  %v1588_v13 = vcombine.low %v243_v4, %v247_v5  ;;  %v1842_v25 = vld [vmem:[#allocation5 + $0x84] ss:$8 sps:$4 sm:$0xff]   ;;  %v1840_v27 = vld [vmem:[#allocation5 + $0x80] ss:$8 sps:$4 sm:$0xff]   ;;  %p2046_p4 = scmp.lt.s32.totalorder %s2309_s12, %s2044_s27  ;;  %p2047_p7 = scmp.lt.s32.totalorder %s2045_s30, %s2039_s20 }
  0x5e   : > { %v255_v11 = vld [vmem:[#allocation2 + $0xb0] sm:$0xff]  ;;  %v1851_v32 = vld [vmem:[#allocation5 + $0x224] ss:$8 sps:$4 sm:$0xff]   ;;  %v1849_v34 = vld [vmem:[#allocation5 + $0x220] ss:$8 sps:$4 sm:$0xff]  }
  0x5f   : > { %436 = vmatpush1.bf16.msra.mxu0 %v1600_v35  ;;  %559 = vmatpush1.bf16.msra.mxu1 %v1606_v36  ;;  %v1830_v12 = vld [vmem:[#allocation5 + $0x54] ss:$8 sps:$4 sm:$0xff]   ;;  %v1597_v14 = vcombine.high %v251_v10, %v255_v11  ;;  %v1828_v15 = vld [vmem:[#allocation5 + $0x50] ss:$8 sps:$4 sm:$0xff]   ;;  %v1596_v19 = vcombine.low %v251_v10, %v255_v11  ;;  %v1854_v33 = vld [vmem:[#allocation5 + $0xa4] ss:$8 sps:$4 sm:$0xff]   ;;  %p2048_p8 = por %p2047_p7, %p2046_p4 }
  0x60   : > { %470 = vmatprep.subr.bf16.mxu0 %v1579_v37  ;;  %1302 = vmatprep.subr.bf16.mxu1 %v1815_v38  ;;  %v259_v16 = vld [vmem:[#allocation2 + $0xd0] sm:$0xff]  ;;  %v1852_v35 = vld [vmem:[#allocation5 + $0xa0] ss:$8 sps:$4 sm:$0xff]   ;;  %v1866_v42 = vld [vmem:[#allocation5 + $0xc4] ss:$8 sps:$4 sm:$0xff]  }
  0x61   : > { %v263_v17 = vld [vmem:[#allocation2 + $0xf0] sm:$0xff]  ;;  %v1861_v43 = vld [vmem:[#allocation5 + $0x240] ss:$8 sps:$4 sm:$0xff]   ;;  %v1875_v49 = vld [vmem:[#allocation5 + $0x264] ss:$8 sps:$4 sm:$0xff]   ;;  %p2049_p11 = pnand %p2048_p8, %p2042_p3 }
  0x62   : > { %v1605_v20 = vcombine.high %v259_v16, %v263_v17  ;;  %v1836_v22 = vld [vmem:[#allocation5 + $0x74] ss:$8 sps:$4 sm:$0xff]   ;;  %v1604_v23 = vcombine.low %v259_v16, %v263_v17  ;;  %v1846_v31 = vld [vmem:[#allocation5 + $0x90] ss:$8 sps:$4 sm:$0xff]   ;;  %v1878_v50 = vld [vmem:[#allocation5 + $0xe4] ss:$8 sps:$4 sm:$0xff]  }
  0x63   : > { %v1845_v28 = vld [vmem:[#allocation5 + $0x214] ss:$8 sps:$4 sm:$0xff]   ;;  %v1855_v38 = vld [vmem:[#allocation5 + $0x230] ss:$8 sps:$4 sm:$0xff]   ;;  %v1897_v62 = vld [vmem:[#allocation5 + $0x2a0] ss:$8 sps:$4 sm:$0xff]  }
  0x64   : > { %v1848_v29 = vld [vmem:[#allocation5 + $0x94] ss:$8 sps:$4 sm:$0xff]   ;;  %v1882_v56 = vld [vmem:[#allocation5 + $0xf0] ss:$8 sps:$4 sm:$0xff]   ;;  %v1909_v4 = vld [vmem:[#allocation5 + $0x2c0] ss:$8 sps:$4 sm:$0xff]  }
  0x65   : > { %v1857_v36 = vld [vmem:[#allocation5 + $0x234] ss:$8 sps:$4 sm:$0xff]   ;;  %v1915_v5 = vld [vmem:[#allocation5 + $0x2d0] ss:$8 sps:$4 sm:$0xff]   ;;  %v1935_v11 = vld [vmem:[#allocation5 + $0x304] ss:$8 sps:$4 sm:$0xff]  }
  0x66   : > { %v1860_v37 = vld [vmem:[#allocation5 + $0xb4] ss:$8 sps:$4 sm:$0xff]   ;;  %v1927_v10 = vld [vmem:[#allocation5 + $0x2f0] ss:$8 sps:$4 sm:$0xff]  }
  0x67   : > { %v1884_v55 = vld [vmem:[#allocation5 + $0xf4] ss:$8 sps:$4 sm:$0xff]  }
  0x68   : > { %v1893_v61 = vld [vmem:[#allocation5 + $0x294] ss:$8 sps:$4 sm:$0xff]  }
  0xd4   : > { %v229_v41 = vpop.permute.xlu0 %228 }
  0xd5   : > { %vm230_vm0 = vcmp.eq.s32.totalorder %v226_v40, %v229_v41  ;;  %v1858_v40 = vld [vmem:[#allocation5 + $0xb0] ss:$8 sps:$4 sm:$0xff]   ;;  %v1863_v41 = vld [vmem:[#allocation5 + $0x244] ss:$8 sps:$4 sm:$0xff]  }
  0xd6   : > { %v231_v45 = vsel %vm230_vm0, 1.0, %v2118_v44  ;;  %v1864_v44 = vld [vmem:[#allocation5 + $0xc0] ss:$8 sps:$4 sm:$0xff]  }
  0xd7   : > { %v2274_v46 = vpack.c.bf16 %v231_v45, %v231_v45  ;;  %v1869_v45 = vld [vmem:[#allocation5 + $0x254] ss:$8 sps:$4 sm:$0xff]  }
  0xd9   : > { %1608 = vmatmul.mubr.msk.bf16.vlgmr.msra.gmra.mrb[0].mxu0 %vm425_vm1, %v2274_v46  ;;  %1611 = vmatmul.mubr.msk.bf16.vlgmr.msra.gmra.mrb[0].mxu1 %vm425_vm1, %v2274_v46 }
  0xda   : > { %471 = vmatpush1.bf16.msra.mxu0 %v1578_v30  ;;  %502 = vmatprep.mubr.bf16.mxu0 %v2117_v0  ;;  %v1843_v30 = vld [vmem:[#allocation5 + $0x210] ss:$8 sps:$4 sm:$0xff]  }
  0xdb   : > { %472 = vmatprep.subr.bf16.mxu0 %v1587_v47  ;;  %1303 = vmatpush1.bf16.msra.mxu1 %v1813_v48  ;;  %v1867_v47 = vld [vmem:[#allocation5 + $0x250] ss:$8 sps:$4 sm:$0xff]  }
  0xdc   : > { %1304 = vmatprep.subr.bf16.mxu1 %v1818_v51  ;;  %v1870_v48 = vld [vmem:[#allocation5 + $0xd0] ss:$8 sps:$4 sm:$0xff]   ;;  %v1873_v51 = vld [vmem:[#allocation5 + $0x260] ss:$8 sps:$4 sm:$0xff]  }
  0xde   : > { %473 = vmatpush1.bf16.msra.mxu0 %v1586_v52  ;;  %v1876_v52 = vld [vmem:[#allocation5 + $0xe0] ss:$8 sps:$4 sm:$0xff]  }
  0xdf   : > { %474 = vmatprep.subr.bf16.mxu0 %v1595_v53  ;;  %1305 = vmatpush1.bf16.msra.mxu1 %v1816_v54  ;;  %v1881_v53 = vld [vmem:[#allocation5 + $0x274] ss:$8 sps:$4 sm:$0xff]   ;;  %v1879_v54 = vld [vmem:[#allocation5 + $0x270] ss:$8 sps:$4 sm:$0xff]  }
  0xe0   : > { %1306 = vmatprep.subr.bf16.mxu1 %v1821_v57  ;;  %v1887_v57 = vld [vmem:[#allocation5 + $0x284] ss:$8 sps:$4 sm:$0xff]  }
  0xe2   : > { %475 = vmatpush1.bf16.msra.mxu0 %v1594_v58  ;;  %v1885_v58 = vld [vmem:[#allocation5 + $0x280] ss:$8 sps:$4 sm:$0xff]  }
  0xe3   : > { %476 = vmatprep.subr.bf16.mxu0 %v1603_v59  ;;  %1307 = vmatpush1.bf16.msra.mxu1 %v1819_v60  ;;  %v1890_v59 = vld [vmem:[#allocation5 + $0x104] ss:$8 sps:$4 sm:$0xff]   ;;  %v1891_v60 = vld [vmem:[#allocation5 + $0x290] ss:$8 sps:$4 sm:$0xff]  }
  0xe4   : > { %1308 = vmatprep.subr.bf16.mxu1 %v1824_v63  ;;  %v1899_v63 = vld [vmem:[#allocation5 + $0x2a4] ss:$8 sps:$4 sm:$0xff]  }
  0xe6   : > { %477 = vmatpush1.bf16.msra.mxu0 %v1602_v1  ;;  %v1905_v1 = vld [vmem:[#allocation5 + $0x2b4] ss:$8 sps:$4 sm:$0xff]  }
  0xe7   : > { %511 = vmatprep.subr.bf16.mxu0 %v1581_v2  ;;  %1309 = vmatpush1.bf16.msra.mxu1 %v1822_v3  ;;  %v1903_v2 = vld [vmem:[#allocation5 + $0x2b0] ss:$8 sps:$4 sm:$0xff]   ;;  %v1911_v3 = vld [vmem:[#allocation5 + $0x2c4] ss:$8 sps:$4 sm:$0xff]  }
  0xe8   : > { %1310 = vmatprep.subr.bf16.mxu1 %v1827_v6  ;;  %v1917_v6 = vld [vmem:[#allocation5 + $0x2d4] ss:$8 sps:$4 sm:$0xff]  }
  0xe9   : > { %1609 = vmatmul.mubr.msk.bf16.vlgmr.msra.gmra.mrb[4].mxu0 %vm425_vm1, %v2274_v46 }
  0xea   : > { %512 = vmatpush1.bf16.msra.mxu0 %v1580_v7  ;;  %543 = vmatprep.mubr.bf16.mxu0 %v2117_v0  ;;  %v1834_v0 = vld [vmem:[#allocation5 + $0x70] ss:$8 sps:$4 sm:$0xff]   ;;  %v1921_v7 = vld [vmem:[#allocation5 + $0x2e0] ss:$8 sps:$4 sm:$0xff]  }
  0xeb   : > { %513 = vmatprep.subr.bf16.mxu0 %v1589_v8  ;;  %1311 = vmatpush1.bf16.msra.mxu1 %v1825_v9  ;;  %v1923_v8 = vld [vmem:[#allocation5 + $0x2e4] ss:$8 sps:$4 sm:$0xff]   ;;  %v1929_v9 = vld [vmem:[#allocation5 + $0x2f4] ss:$8 sps:$4 sm:$0xff]  }
  0xec   : > { %1312 = vmatprep.subr.bf16.mxu1 %v1830_v12 }
  0xee   : > { %514 = vmatpush1.bf16.msra.mxu0 %v1588_v13 }
  0xef   : > { %515 = vmatprep.subr.bf16.mxu0 %v1597_v14  ;;  %1313 = vmatpush1.bf16.msra.mxu1 %v1828_v15 }
  0xf0   : > { %1314 = vmatprep.subr.bf16.mxu1 %v1833_v18 }
  0xf2   : > { %516 = vmatpush1.bf16.msra.mxu0 %v1596_v19  ;;  %v1888_v19 = vld [vmem:[#allocation5 + $0x100] ss:$8 sps:$4 sm:$0xff]  }
  0xf3   : > { %517 = vmatprep.subr.bf16.mxu0 %v1605_v20  ;;  %1315 = vmatpush1.bf16.msra.mxu1 %v1831_v21 }
  0xf4   : > { %1316 = vmatprep.subr.bf16.mxu1 %v1836_v22 }
  0xf6   : > { %518 = vmatpush1.bf16.msra.mxu0 %v1604_v23  ;;  %v1896_v23 = vld [vmem:[#allocation5 + $0x114] ss:$8 sps:$4 sm:$0xff]  }
  0xf7   : > { %1317 = vmatpush1.bf16.msra.mxu1 %v1834_v0  ;;  %1384 = vmatprep.subr.bf16.mxu0 %v1839_v24  ;;  %v1894_v0 = vld [vmem:[#allocation5 + $0x110] ss:$8 sps:$4 sm:$0xff]   ;;  %v1902_v24 = vld [vmem:[#allocation5 + $0x124] ss:$8 sps:$4 sm:$0xff]  }
  0xf8   : > { %1318 = vmatprep.subr.bf16.mxu1 %v1842_v25  ;;  %v1900_v25 = vld [vmem:[#allocation5 + $0x120] ss:$8 sps:$4 sm:$0xff]  }
  0xf9   : > { %1610 = vmatmul.mubr.msk.bf16.vlgmr.msra.gmra.mrb[8].mxu0 %vm425_vm1, %v2274_v46  ;;  %v1872_v46 = vld [vmem:[#allocation5 + $0xd4] ss:$8 sps:$4 sm:$0xff]  }
  0xfa   : > { %1385 = vmatpush1.bf16.msra.mxu0 %v1837_v26  ;;  %v1908_v26 = vld [vmem:[#allocation5 + $0x134] ss:$8 sps:$4 sm:$0xff]  }
  0xfb   : > { %1319 = vmatpush1.bf16.msra.mxu1 %v1840_v27  ;;  %1386 = vmatprep.subr.bf16.mxu0 %v1845_v28  ;;  %v1906_v27 = vld [vmem:[#allocation5 + $0x130] ss:$8 sps:$4 sm:$0xff]   ;;  %v1914_v28 = vld [vmem:[#allocation5 + $0x144] ss:$8 sps:$4 sm:$0xff]  }
  0xfc   : > { %1320 = vmatprep.subr.bf16.mxu1 %v1848_v29 }
  0xfe   : > { %1387 = vmatpush1.bf16.msra.mxu0 %v1843_v30 }
  0xff   : > { %1321 = vmatpush1.bf16.msra.mxu1 %v1846_v31  ;;  %1388 = vmatprep.subr.bf16.mxu0 %v1851_v32 }
 0x100   : > { %1322 = vmatprep.subr.bf16.mxu1 %v1854_v33  ;;  %v1912_v33 = vld [vmem:[#allocation5 + $0x140] ss:$8 sps:$4 sm:$0xff]  }
 0x102   : > { %1389 = vmatpush1.bf16.msra.mxu0 %v1849_v34 }
 0x103   : > { %1323 = vmatpush1.bf16.msra.mxu1 %v1852_v35  ;;  %1390 = vmatprep.subr.bf16.mxu0 %v1857_v36  ;;  %v1920_v35 = vld [vmem:[#allocation5 + $0x154] ss:$8 sps:$4 sm:$0xff]   ;;  %v1918_v36 = vld [vmem:[#allocation5 + $0x150] ss:$8 sps:$4 sm:$0xff]  }
 0x104   : > { %1324 = vmatprep.subr.bf16.mxu1 %v1860_v37  ;;  %v1926_v37 = vld [vmem:[#allocation5 + $0x164] ss:$8 sps:$4 sm:$0xff]  }
 0x106   : > { %1391 = vmatpush1.bf16.msra.mxu0 %v1855_v38  ;;  %v1924_v38 = vld [vmem:[#allocation5 + $0x160] ss:$8 sps:$4 sm:$0xff]  }
 0x107   : > { %1325 = vmatpush1.bf16.msra.mxu1 %v1858_v40  ;;  %1392 = vmatprep.subr.bf16.mxu0 %v1863_v41  ;;  %v1932_v40 = vld [vmem:[#allocation5 + $0x174] ss:$8 sps:$4 sm:$0xff]   ;;  %v1930_v41 = vld [vmem:[#allocation5 + $0x170] ss:$8 sps:$4 sm:$0xff]  }
 0x108   : > { %1326 = vmatprep.subr.bf16.mxu1 %v1866_v42  ;;  %v1938_v42 = vld [vmem:[#allocation5 + $0x184] ss:$8 sps:$4 sm:$0xff]  }
 0x10a   : > { %1393 = vmatpush1.bf16.msra.mxu0 %v1861_v43 }
 0x10b   : > { %1327 = vmatpush1.bf16.msra.mxu1 %v1864_v44  ;;  %1394 = vmatprep.subr.bf16.mxu0 %v1869_v45 }
 0x10c   : > { %1328 = vmatprep.subr.bf16.mxu1 %v1872_v46 }
 0x10e   : > { %1395 = vmatpush1.bf16.msra.mxu0 %v1867_v47  ;;  %v1933_v47 = vld [vmem:[#allocation5 + $0x300] ss:$8 sps:$4 sm:$0xff]  }
 0x10f   : > { %1329 = vmatpush1.bf16.msra.mxu1 %v1870_v48  ;;  %1396 = vmatprep.subr.bf16.mxu0 %v1875_v49  ;;  %v1936_v48 = vld [vmem:[#allocation5 + $0x180] ss:$8 sps:$4 sm:$0xff]  }
 0x110   : > { %1330 = vmatprep.subr.bf16.mxu1 %v1878_v50 }
 0x112   : > { %1397 = vmatpush1.bf16.msra.mxu0 %v1873_v51  ;;  %v1941_v51 = vld [vmem:[#allocation5 + $0x314] ss:$8 sps:$4 sm:$0xff]  }
 0x113   : > { %1331 = vmatpush1.bf16.msra.mxu1 %v1876_v52  ;;  %1398 = vmatprep.subr.bf16.mxu0 %v1881_v53  ;;  %v1944_v52 = vld [vmem:[#allocation5 + $0x194] ss:$8 sps:$4 sm:$0xff]  }
 0x114   : > { %1332 = vmatprep.subr.bf16.mxu1 %v1884_v55  ;;  %v1942_v55 = vld [vmem:[#allocation5 + $0x190] ss:$8 sps:$4 sm:$0xff]  }
 0x116   : > { %1399 = vmatpush1.bf16.msra.mxu0 %v1879_v54  ;;  %v1939_v54 = vld [vmem:[#allocation5 + $0x310] ss:$8 sps:$4 sm:$0xff]  }
 0x117   : > { %1333 = vmatpush1.bf16.msra.mxu1 %v1882_v56  ;;  %1400 = vmatprep.subr.bf16.mxu0 %v1887_v57  ;;  %v1947_v56 = vld [vmem:[#allocation5 + $0x324] ss:$8 sps:$4 sm:$0xff]  }
 0x118   : > { %1343 = vmatprep.subr.bf16.mxu1 %v1890_v59  ;;  %v1950_v57 = vld [vmem:[#allocation5 + $0x1a4] ss:$8 sps:$4 sm:$0xff]   ;;  %v1948_v59 = vld [vmem:[#allocation5 + $0x1a0] ss:$8 sps:$4 sm:$0xff]  }
 0x11a   : > { %1401 = vmatpush1.bf16.msra.mxu0 %v1885_v58  ;;  %v1945_v58 = vld [vmem:[#allocation5 + $0x320] ss:$8 sps:$4 sm:$0xff]  }
 0x11b   : > { %1402 = vmatprep.subr.bf16.mxu0 %v1893_v61  ;;  %v1956_v61 = vld [vmem:[#allocation5 + $0x1b4] ss:$8 sps:$4 sm:$0xff]  }
 0x11e   : > { %1403 = vmatpush1.bf16.msra.mxu0 %v1891_v60  ;;  %v1953_v60 = vld [vmem:[#allocation5 + $0x334] ss:$8 sps:$4 sm:$0xff]  }
 0x11f   : > { %1404 = vmatprep.subr.bf16.mxu0 %v1899_v63  ;;  %v1954_v63 = vld [vmem:[#allocation5 + $0x1b0] ss:$8 sps:$4 sm:$0xff]  }
 0x122   : > { %1405 = vmatpush1.bf16.msra.mxu0 %v1897_v62  ;;  %v1951_v62 = vld [vmem:[#allocation5 + $0x330] ss:$8 sps:$4 sm:$0xff]  }
 0x123   : > { %1406 = vmatprep.subr.bf16.mxu0 %v1905_v1  ;;  %v1959_v1 = vld [vmem:[#allocation5 + $0x344] ss:$8 sps:$4 sm:$0xff]  }
 0x126   : > { %1407 = vmatpush1.bf16.msra.mxu0 %v1903_v2  ;;  %v1962_v2 = vld [vmem:[#allocation5 + $0x1c4] ss:$8 sps:$4 sm:$0xff]  }
 0x127   : > { %1408 = vmatprep.subr.bf16.mxu0 %v1911_v3  ;;  %v1957_v3 = vld [vmem:[#allocation5 + $0x340] ss:$8 sps:$4 sm:$0xff]  }
 0x12a   : > { %1409 = vmatpush1.bf16.msra.mxu0 %v1909_v4  ;;  %v1960_v4 = vld [vmem:[#allocation5 + $0x1c0] ss:$8 sps:$4 sm:$0xff]  }
 0x12b   : > { %1410 = vmatprep.subr.bf16.mxu0 %v1917_v6  ;;  %v1968_v6 = vld [vmem:[#allocation5 + $0x1d4] ss:$8 sps:$4 sm:$0xff]  }
 0x12e   : > { %1411 = vmatpush1.bf16.msra.mxu0 %v1915_v5  ;;  %v1965_v5 = vld [vmem:[#allocation5 + $0x354] ss:$8 sps:$4 sm:$0xff]  }
 0x12f   : > { %1412 = vmatprep.subr.bf16.mxu0 %v1923_v8  ;;  %v1966_v8 = vld [vmem:[#allocation5 + $0x1d0] ss:$8 sps:$4 sm:$0xff]  }
 0x132   : > { %1413 = vmatpush1.bf16.msra.mxu0 %v1921_v7  ;;  %v1963_v7 = vld [vmem:[#allocation5 + $0x350] ss:$8 sps:$4 sm:$0xff]  }
 0x133   : > { %1414 = vmatprep.subr.bf16.mxu0 %v1929_v9  ;;  %v1971_v9 = vld [vmem:[#allocation5 + $0x364] ss:$8 sps:$4 sm:$0xff]  }
 0x136   : > { %1415 = vmatpush1.bf16.msra.mxu0 %v1927_v10  ;;  %v1974_v10 = vld [vmem:[#allocation5 + $0x1e4] ss:$8 sps:$4 sm:$0xff]  }
 0x137   : > { %1425 = vmatprep.subr.bf16.mxu0 %v1935_v11  ;;  %v1969_v11 = vld [vmem:[#allocation5 + $0x360] ss:$8 sps:$4 sm:$0xff]  }
 0x1ac   : > { %v463_v12 = vpop.f32.mrb[0].mxu0  ;;  %v2286_v13 = vpop.f32.mrb[0].mxu1 }
 0x1ad   : > { %v465_v14 = vpop.f32.mrb[1].mxu0  ;;  %v2288_v15 = vpop.f32.mrb[1].mxu1  ;;  %v593_v20 = vpack.c.bf16 %v463_v12, %v463_v12  ;;  %v1972_v12 = vld [vmem:[#allocation5 + $0x1e0] ss:$8 sps:$4 sm:$0xff]  }
 0x1ae   : > { %v594_v16 = vpack.c.bf16 %v465_v14, %v465_v14  ;;  %v467_v17 = vpop.f32.mrb[2].mxu0  ;;  %v590_v18 = vpop.f32.mrb[2].mxu1  ;;  %v600_v53 = vpack.c.bf16 %v2288_v15, %v2288_v15  ;;  %v1977_v14 = vld [vmem:[#allocation5 + $0x374] ss:$8 sps:$4 sm:$0xff]  }
 0x1af   : > { %v468_v21 = vpop.f32.mrb[3].mxu0  ;;  %v591_v22 = vpop.f32.mrb[3].mxu1  ;;  %v1980_v15 = vld [vmem:[#allocation5 + $0x1f4] ss:$8 sps:$4 sm:$0xff]   ;;  %v1975_v17 = vld [vmem:[#allocation5 + $0x370] ss:$8 sps:$4 sm:$0xff]  }
 0x1b0   : > { %1334 = vmatprep.mubr.bf16.mxu1 %v594_v16  ;;  %v713_v16 = vld [vmem:[#allocation5 + $0x380] sm:$0x33]  ;;  %v1978_v18 = vld [vmem:[#allocation5 + $0x1f0] ss:$8 sps:$4 sm:$0xff]  }
 0x1b1   : > { %1335 = vmatmul.mubr.bf16.vlgmr.msra.gmra.mrb[4].mxu1 %v593_v20  ;;  %v1724_v20 = vcombine.low %v713_v16, %v713_v16 }
 0x1b2   : > { %1344 = vmatpush1.bf16.msra.mxu1 %v1888_v19  ;;  %v1725_v19 = vcombine.high %v713_v16, %v713_v16 }
 0x1b3   : > { %1345 = vmatprep.subr.bf16.mxu1 %v1896_v23  ;;  %v1297_v22 = vsel %vm1295_vm3, %v1724_v20, 0  ;;  %v599_v23 = vpack.c.bf16 %v2286_v13, %v2286_v13 }
 0x1b6   : > { %1346 = vmatpush1.bf16.msra.mxu1 %v1894_v0  ;;  %v717_v0 = vshrl.u32 %v225_v39, 7 }
 0x1b7   : > { %1347 = vmatprep.subr.bf16.mxu1 %v1902_v24 }
 0x1b8   : > { %v718_v24 = vsub.s32 0, %v717_v0 }
 0x1ba   : > { %1348 = vmatpush1.bf16.msra.mxu1 %v1900_v25  ;;  %v714_v25 = vld [vmem:[%s2352_s3] sm:$0x3] }
 0x1bb   : > { %1349 = vmatprep.subr.bf16.mxu1 %v1908_v26  ;;  %v722_v26 = vsub.s32 1, %v717_v0 }
 0x1bc   : > { %v2290_v29 = vpop.f32.mrb[4].mxu0 }
 0x1bd   : > { %v506_v30 = vpop.f32.mrb[5].mxu0  ;;  %v595_v21 = vpack.c.bf16 %v2290_v29, %v2290_v29 }
 0x1be   : > { %v596_v31 = vpack.c.bf16 %v506_v30, %v506_v30  ;;  %v508_v32 = vpop.f32.mrb[6].mxu0  ;;  %1350 = vmatpush1.bf16.msra.mxu1 %v1906_v27  ;;  %v719_v27 = vrot.slane %v714_v25, %v718_v24 }
 0x1bf   : > { %v509_v34 = vpop.f32.mrb[7].mxu0  ;;  %1351 = vmatprep.subr.bf16.mxu1 %v1914_v28  ;;  %v723_v28 = vrot.slane %v714_v25, %v722_v26 }
 0x1c0   : > { %1375 = vmatprep.mubr.bf16.mxu1 %v596_v31 }
 0x1c2   : > { %1352 = vmatpush1.bf16.msra.mxu1 %v1912_v33 }
 0x1c3   : > { %1353 = vmatprep.subr.bf16.mxu1 %v1920_v35 }
 0x1c6   : > { %1354 = vmatpush1.bf16.msra.mxu1 %v1918_v36 }
 0x1c7   : > { %1355 = vmatprep.subr.bf16.mxu1 %v1926_v37 }
 0x1ca   : > { %1356 = vmatpush1.bf16.msra.mxu1 %v1924_v38 }
 0x1cb   : > { %1357 = vmatprep.subr.bf16.mxu1 %v1932_v40 }
 0x1cc   : > { %v545_v43 = vpop.f32.mrb[8].mxu0 }
 0x1cd   : > { %v547_v44 = vpop.f32.mrb[9].mxu0  ;;  %v597_v49 = vpack.c.bf16 %v545_v43, %v545_v43 }
 0x1ce   : > { %v598_v45 = vpack.c.bf16 %v547_v44, %v547_v44  ;;  %v549_v46 = vpop.f32.mrb[10].mxu0  ;;  %1358 = vmatpush1.bf16.msra.mxu1 %v1930_v41 }
 0x1cf   : > { %v550_v50 = vpop.f32.mrb[11].mxu0  ;;  %1359 = vmatprep.subr.bf16.mxu1 %v1938_v42 }
 0x1d0   : > { %1416 = vmatprep.mubr.bf16.mxu0 %v598_v45 }
 0x1d1   : > { %1417 = vmatmul.mubr.bf16.vlgmr.msra.gmra.mrb[12].mxu0 %v597_v49 }
 0x1d2   : > { %1426 = vmatpush1.bf16.msra.mxu0 %v1933_v47  ;;  %1360 = vmatpush1.bf16.msra.mxu1 %v1936_v48 }
 0x1d3   : > { %1727 = vmatprep.mubr.msk.bf16.mxu0 %vm1291_vm2, %v600_v53  ;;  %1427 = vmatprep.subr.bf16.mxu0 %v1941_v51 }
 0x1d4   : > { %1361 = vmatprep.subr.bf16.mxu1 %v1944_v52 }
 0x1d6   : > { %1428 = vmatpush1.bf16.msra.mxu0 %v1939_v54  ;;  %1362 = vmatpush1.bf16.msra.mxu1 %v1942_v55 }
 0x1d7   : > { %1429 = vmatprep.subr.bf16.mxu0 %v1947_v56  ;;  %1363 = vmatprep.subr.bf16.mxu1 %v1950_v57 }
 0x1da   : > { %1430 = vmatpush1.bf16.msra.mxu0 %v1945_v58  ;;  %1364 = vmatpush1.bf16.msra.mxu1 %v1948_v59 }
 0x1db   : > { %1431 = vmatprep.subr.bf16.mxu0 %v1953_v60  ;;  %1365 = vmatprep.subr.bf16.mxu1 %v1956_v61 }
 0x1de   : > { %1432 = vmatpush1.bf16.msra.mxu0 %v1951_v62  ;;  %1366 = vmatpush1.bf16.msra.mxu1 %v1954_v63 }
 0x1df   : > { %1433 = vmatprep.subr.bf16.mxu0 %v1959_v1  ;;  %1367 = vmatprep.subr.bf16.mxu1 %v1962_v2 }
 0x1e2   : > { %1434 = vmatpush1.bf16.msra.mxu0 %v1957_v3  ;;  %1368 = vmatpush1.bf16.msra.mxu1 %v1960_v4 }
 0x1e3   : > { %1435 = vmatprep.subr.bf16.mxu0 %v1965_v5  ;;  %1369 = vmatprep.subr.bf16.mxu1 %v1968_v6 }
 0x1e6   : > { %1436 = vmatpush1.bf16.msra.mxu0 %v1963_v7  ;;  %1370 = vmatpush1.bf16.msra.mxu1 %v1966_v8 }
 0x1e7   : > { %1437 = vmatprep.subr.bf16.mxu0 %v1971_v9  ;;  %1371 = vmatprep.subr.bf16.mxu1 %v1974_v10 }
 0x1ea   : > { %1438 = vmatpush1.bf16.msra.mxu0 %v1969_v11  ;;  %1372 = vmatpush1.bf16.msra.mxu1 %v1972_v12 }
 0x1eb   : > { %1439 = vmatprep.subr.bf16.mxu0 %v1977_v14  ;;  %1373 = vmatprep.subr.bf16.mxu1 %v1980_v15 }
 0x1ee   : > { %1440 = vmatpush1.bf16.msra.mxu0 %v1975_v17  ;;  %1374 = vmatpush1.bf16.msra.mxu1 %v1978_v18 }
 0x1ef   : > { %1726 = vmatprep.subr.msk.bf16.mxu0 %vm1295_vm3, %v1725_v19 }
 0x1f1   : > { %1376 = vmatmul.mubr.bf16.vlgmr.msra.gmra.mrb[4].mxu1 %v595_v21 }
 0x1f2   : > { %1442 = vmatpush1.bf16.msra.mxu0 %v1297_v22 }
 0x1f5   : > { %1458 = vmatmul.mubr.bf16.vlgmr.msra.gmra.mrb[12].mxu0 %v599_v23 }
 0x2c4   : > { %v1377_v29 = vpop.f32.mrb[4].mxu1 }
 0x2c5   : > { %v1734_v30 = vadd.f32 %v1377_v29, %v719_v27  ;;  %v1379_v31 = vpop.f32.mrb[5].mxu1 }
 0x2c6   : > { %v1736_v32 = vadd.f32 %v1379_v31, %v723_v28  ;;  %v1381_v33 = vpop.f32.mrb[6].mxu1 }
 0x2c7   : > { %v1382_v13 = vpop.f32.mrb[7].mxu1 }
 0x2c8   : > { %v1459_v34 = vpop.f32.mrb[12].mxu0 }
 0x2c9   : > { %v1735_v35 = vadd.f32 %v1734_v30, %v1459_v34  ;;  %v1461_v39 = vpop.f32.mrb[13].mxu0 }
 0x2ca   : > { %v1737_v36 = vadd.f32 %v1736_v32, %v1461_v39  ;;  %v1463_v37 = vpop.f32.mrb[14].mxu0 }
 0x2cb   : > { %v1466_v38 = vmax.f32 %v1735_v35, 0.0  ;;  %v1464_v40 = vpop.f32.mrb[15].mxu0 }
 0x2cc   : > { %v1467_v41 = vmax.f32 %v1737_v36, 0.0 }
 0x2cd   : > { %1468 = vst [vmem:[%s218_s11] sm:$0xff] %v1466_v38 }
 0x2ce   : > { %1469 = vst [vmem:[%s218_s11 + $0x8] sm:$0xff] %v1467_v41 }
 0x2cf   : > { %2052 = shalt.err (!%p2049_p11)
}
 0x2d0   : > { %s2053_s6 = scalar_lea.hbm %s2307_s14, 256  ;;  %s2057_s5 = scalar_lea.hbm %s2353_s4, 512 }
 0x2d1   : > { %p2054_p13 = scmp.ne.s32.totalorder %s2307_s14, %s2053_s6  ;;  %p2058_p6 = scmp.lt.u32.totalorder %s2307_s14, %s2353_s4 }
 0x2d2   : > { %p2059_p9 = scmp.lt.u32.totalorder %s2057_s5, %s2053_s6  ;;  %p2061_p12 = scmp.lt.u32.totalorder %s2053_s6, %s2307_s14 }
 0x2d3   : > { %p2055_p0 = pnand %p2054_p13, %p2366_p1 }
 0x2d4   : > { %p2060_p10 = por %p2059_p9, %p2058_p6 }
 0x2d5   : > { %p2056_p5 = pneg %p2055_p0 }
 0x2d6   : > { %p2062_p2 = por %p2061_p12, %p2060_p10 }
 0x2d8   : > { %p2063_p3 = pnand %p2062_p2, %p2056_p5 }
 0x2da   : > { %2066 = shalt.err (!%p2063_p3)
}
 0x2db   : > { %1754 = dma.vmem_to_hbm [thread:$0]  (%p2366_p1), %s2309_s12, 256, %s2307_s14, %s1471_s19  }
 0x2dc PF: > { %p1771_p4 = scmp.ge.s32.totalorder %s2109_s18, 2  ;;  %s1497_s9 = sand.u32 1, %s2097_s15  }
 0x2dd   : > { %p2367_p7 = scmp.ne.s32.totalorder %s2358_s26, 0  ;;  %s1498_s10 = scalar_lea.sflag [#allocation4], %s1497_s9 }
 0x2df   : > { %p1764_p8 = pnand %p1771_p4, %p2367_p7 }
 0x2e1   : > { %2092 = dma.done.wait (!%p1764_p8), %s1498_s10, 256  }
 0x2e2   : > { %2094 = vsyncadd (!%p1764_p8), %s1498_s10, 4294967040  ;;  %p16_p11 = scmp.ge.s32.totalorder %s2170_s21, 4   ;;  %s2368_s15 = smov %s2101_s16 }
 0x2e3   : > { %s2369_s16 = smov %s2105_s17  ;;  %s2370_s17 = smov %s2181_s24 }
 0x2e4   : > { %s2371_s18 = smov %s2170_s21  ;;  %18 = sbr.rel (!%p16_p11) target bundleno = 5 (0x5), region = 80 }
 0x2eb   :  { %1503 = vsyncpa [#allocation3], 1 }
 0x2ec   :  { %1505 = vsyncpa [#allocation3 + $0x1], 1 }
 0x2ed   :  { %1506 = vsyncpa [#allocation6], 1 }
 0x2ee   :  { %1507 = vsyncpa [#allocation4], 1 }
 0x2ef   :  { %1509 = vsyncpa [#allocation4 + $0x1], 1 }

</bundles_post_ra>
